<compile_context>
chip_gen: v5e
topology: v5e:2x2
jax: 0.10.0
libtpu: 0.0.40
codegen_flags: <defaults>
</compile_context>

<pallas_src>
import functools

import jax
import jax.numpy as jnp
from jax.experimental import pallas as pl
from jax.experimental.pallas import tpu as pltpu

LANE = 128  # TPU lane width (last vreg dim)


def _round_up(x, m):
    return (x + m - 1) // m * m


def _mlp_policy_kernel(discrete, n_layers, bf16_tanh, *refs):
    """Hot path: bf16 MXU matmuls with f32 accumulation, tanh, exact softmax.

    refs = (obs, (w_i, b_i) * n_layers, w_out, b_out, out)
    Hidden feature dims are lane-padded (padded weight rows/cols are zero);
    obs and the output layer's N dim are left at their logical sizes.
    """
    idx = 0
    obs_ref = refs[idx]; idx += 1
    # obs arrives raw f32 (block_b, ob_dim); cast to bf16 in-kernel (MXU input).
    x = obs_ref[...].astype(jnp.bfloat16)

    # Hidden layers: Linear -> Tanh (ptu.build_mlp default activation).
    for _ in range(n_layers):
        w_ref = refs[idx]
        b_ref = refs[idx + 1]
        idx += 2
        h = jnp.dot(x, w_ref[...], preferred_element_type=jnp.float32) + b_ref[...]
        if bf16_tanh:
            # v6e / v7x: EUP is bf16-capable -> half the EUP pushes, no extra cast.
            x = jnp.tanh(h.astype(jnp.bfloat16))
        else:
            # v5e-safe default: f32 tanh, then cast for the next MXU matmul.
            x = jnp.tanh(h).astype(jnp.bfloat16)

    # Output layer: Linear -> identity. w_out is narrow in N (= ac_dim).
    w_out_ref = refs[idx]
    b_out_ref = refs[idx + 1]
    idx += 2
    out = jnp.dot(x, w_out_ref[...], preferred_element_type=jnp.float32) + b_out_ref[...]

    out_ref = refs[idx]
    if discrete:
        # Exact softmax over the logical ac_dim lanes. No padded lanes to mask
        # (output layer is narrow) and exact division keeps sum(probs) == 1.
        m = jnp.max(out, axis=-1, keepdims=True)
        e = jnp.exp(out - m)
        out_ref[...] = e / jnp.sum(e, axis=-1, keepdims=True)
    else:
        out_ref[...] = out  # mean


def _resident_spec(shape):
    # Whole-array block, resident across the batch grid axis.
    return pl.BlockSpec(shape, lambda i: (0,) * len(shape))


def mlp_policy_forward(obs, params, *, discrete, n_layers, block_b=None, bf16_tanh=False):
    """Wrapper: picks the batch tile, sets up BlockSpecs / grid, calls the kernel."""
    B, ob_dim = obs.shape
    ac_dim = params["ac_dim"]

    # Batch tile: multiple of 16 (bf16 sublane packing), large to amortize the
    # ~0.35us per-grid-step overhead, but >= 2 grid steps for non-trivial B so
    # the "parallel" batch axis can shard across both v7x TensorCores.
    if block_b is None:
        if B <= 16:
            block_b = _round_up(max(B, 1), 16)
        else:
            block_b = min(_round_up(pl.cdiv(B, 2), 16), 2048)
    B_pad = _round_up(B, block_b)

    # Only the batch dim is zero-padded; obs stays raw f32 with ob_dim lanes
    # (no host-side lane padding or bf16 copy -> far less obs HBM traffic).
    obs_p = obs if B_pad == B else jnp.pad(obs, ((0, B_pad - B), (0, 0)))

    inputs = [obs_p]
    in_specs = [pl.BlockSpec((block_b, ob_dim), lambda i: (i, 0))]

    for (w, b) in params["hidden"]:
        inputs += [w, b]
        in_specs += [_resident_spec(w.shape), _resident_spec(b.shape)]

    inputs += [params["w_out"], params["b_out"]]
    in_specs += [_resident_spec(params["w_out"].shape), _resident_spec(params["b_out"].shape)]

    # Narrow (B_pad, ac_dim) f32 output: ~32x less HBM writeback than a
    # 128-lane-padded f32 block for small ac_dim; masked vst is cheaper here
    # than the extra bytes, and f32 keeps the probs exactly normalized.
    out_shape = jax.ShapeDtypeStruct((B_pad, ac_dim), jnp.float32)
    out_specs = pl.BlockSpec((block_b, ac_dim), lambda i: (i, 0))

    # Honest VMEM budget (no 4x slush): double-buffered obs/out blocks,
    # double-buffered resident weights/biases, in-flight activation headroom.
    max_feat = max([w.shape[1] for (w, _) in params["hidden"]] + [ob_dim, ac_dim])
    vmem_needed = 2 * block_b * ob_dim * 4            # obs blocks (f32)
    vmem_needed += 2 * block_b * ac_dim * 4           # output blocks (f32)
    for a in inputs[1:]:
        vmem_needed += 2 * a.size * a.dtype.itemsize  # weights / biases
    vmem_needed += 6 * block_b * max_feat * 4         # in-flight activations
    vmem_limit = min(max(2 * vmem_needed, 8 << 20), 64 << 20)

    kernel = functools.partial(_mlp_policy_kernel, discrete, n_layers, bf16_tanh)

    out = pl.pallas_call(
        kernel,
        out_shape=out_shape,
        grid_spec=pltpu.PrefetchScalarGridSpec(
            num_scalar_prefetch=0,
            grid=(B_pad // block_b,),
            in_specs=in_specs,
            out_specs=out_specs,
        ),
        compiler_params=pltpu.CompilerParams(
            dimension_semantics=("parallel",),
            vmem_limit_bytes=vmem_limit,
        ),
    )(*inputs)

    out = out[:B]
    if discrete:
        return out  # Categorical probs (rows sum to 1)
    mean = out
    # std is observation-independent: one tiny host-JAX exp + broadcast
    # (Normal(mean, std) broadcasting), not a per-step kernel output.
    std = jnp.broadcast_to(jnp.exp(params["logstd"]), mean.shape)
    return mean, std


def _init_linear(key, in_dim, out_dim):
    """Deterministic init matching nn.Linear's U(-1/sqrt(fan_in), 1/sqrt(fan_in))."""
    kw, kb = jax.random.split(key)
    bound = 1.0 / jnp.sqrt(jnp.float32(in_dim))
    w = jax.random.uniform(kw, (in_dim, out_dim), jnp.float32, -bound, bound)
    b = jax.random.uniform(kb, (1, out_dim), jnp.float32, -bound, bound)
    return w, b


def make_params(key, ob_dim, ac_dim, n_layers, layer_size, discrete):
    """Builds raw (f32, unpadded) params and kernel-ready params.

    Kernel layout: hidden weights bf16, N lane-padded (zeros); first layer keeps
    K = ob_dim (raw obs feed the kernel unpadded; Mosaic pads K for the MXU
    internally). Output weight is bf16, K lane-padded, N = ac_dim (narrow).
    Biases stay f32; padded hidden-bias lanes are exactly zero.
    """
    keys = jax.random.split(key, n_layers + 1)
    raw_hidden = []
    in_dim = ob_dim
    for l in range(n_layers):
        raw_hidden.append(_init_linear(keys[l], in_dim, layer_size))
        in_dim = layer_size
    w_out, b_out = _init_linear(keys[-1], in_dim, ac_dim)

    layer_p = _round_up(layer_size, LANE)

    def pad_hidden_w(w, first):
        ip = w.shape[0] if first else _round_up(w.shape[0], LANE)
        return jnp.pad(
            w, ((0, ip - w.shape[0]), (0, layer_p - w.shape[1]))
        ).astype(jnp.bfloat16)

    def pad_hidden_b(b):
        return jnp.pad(b, ((0, 0), (0, layer_p - b.shape[1])))  # f32, padded lanes = 0

    hidden = [
        (pad_hidden_w(w, l == 0), pad_hidden_b(b)) for l, (w, b) in enumerate(raw_hidden)
    ]

    if n_layers == 0:
        w_out_k = w_out.astype(jnp.bfloat16)  # (ob_dim, ac_dim)
    else:
        w_out_k = jnp.pad(
            w_out, ((0, layer_p - w_out.shape[0]), (0, 0))
        ).astype(jnp.bfloat16)  # (layer_p, ac_dim)

    params = {
        "hidden": hidden,
        "w_out": w_out_k,
        "b_out": b_out,  # f32 (1, ac_dim), no padding
        "ac_dim": ac_dim,
        "raw": {"hidden": raw_hidden, "w_out": w_out, "b_out": b_out},
    }
    if not discrete:
        # nn.Parameter(torch.zeros(ac_dim))
        params["logstd"] = jnp.zeros((1, ac_dim), jnp.float32)
    return params


def _reference_forward(obs, params, discrete):
    """Pure f32 reference (unpadded weights)."""
    x = obs
    for (w, b) in params["raw"]["hidden"]:
        x = jnp.tanh(x @ w + b)
    out = x @ params["raw"]["w_out"] + params["raw"]["b_out"]
    if discrete:
        return jax.nn.softmax(out, axis=-1)
    mean = out
    std = jnp.broadcast_to(jnp.exp(params["logstd"]), mean.shape)
    return mean, std


if __name__ == "__main__":
    # Small shapes consistent with MLPPolicy.__init__
    B, ob_dim, ac_dim = 16, 16, 4
    n_layers, layer_size = 2, 32

    key = jax.random.PRNGKey(0)
    k_obs, k_disc, k_cont = jax.random.split(key, 3)
    obs = jax.random.normal(k_obs, (B, ob_dim), jnp.float32)

    # --- discrete branch: Categorical(probs=softmax(logits_net(obs))) ---
    params_d = make_params(k_disc, ob_dim, ac_dim, n_layers, layer_size, discrete=True)
    probs = mlp_policy_forward(obs, params_d, discrete=True, n_layers=n_layers)
    probs = jax.block_until_ready(probs)
    ref_probs = _reference_forward(obs, params_d, discrete=True)
    # bf16 matmuls -> slightly loosened tolerance vs f32 reference.
    assert jnp.allclose(probs, ref_probs, atol=1e-2, rtol=1e-2), "discrete probs mismatch"
    # Exact softmax normalization (no approx reciprocal) -> tight tolerance.
    assert jnp.allclose(jnp.sum(probs, axis=-1), 1.0, atol=1e-4), "probs not normalized"

    # --- continuous branch: Normal(mean_net(obs), exp(logstd)) ---
    params_c = make_params(k_cont, ob_dim, ac_dim, n_layers, layer_size, discrete=False)
    mean, std = mlp_policy_forward(obs, params_c, discrete=False, n_layers=n_layers)
    mean, std = jax.block_until_ready((mean, std))
    ref_mean, ref_std = _reference_forward(obs, params_c, discrete=False)
    assert jnp.allclose(mean, ref_mean, atol=1e-2, rtol=1e-2), "continuous mean mismatch"
    assert jnp.allclose(std, ref_std, atol=1e-6, rtol=1e-6), "continuous std mismatch"

    # TODO(synk): Categorical.sample() / Normal.rsample() in get_action are stochastic
    # sampling on top of the distribution parameters; the kernel returns the
    # distribution parameters (probs / mean+std), sampling stays in host JAX.
    print("KERNEL_OK")
</pallas_src>

<mosaic_0001>
module attributes {stable_mosaic.version = 11 : i64} {
  func.func @_mlp_policy_kernel(%arg0: i32, %arg1: memref<16x16xf32, #tpu.memory_space<vmem>>, %arg2: memref<16x128xbf16, #tpu.memory_space<vmem>>, %arg3: memref<1x128xf32, #tpu.memory_space<vmem>>, %arg4: memref<128x128xbf16, #tpu.memory_space<vmem>>, %arg5: memref<1x128xf32, #tpu.memory_space<vmem>>, %arg6: memref<128x4xbf16, #tpu.memory_space<vmem>>, %arg7: memref<1x4xf32, #tpu.memory_space<vmem>>, %arg8: memref<16x4xf32, #tpu.memory_space<vmem>>) attributes {dimension_semantics = [#tpu.dimension_semantics<parallel>], iteration_bounds = array<i64: 1>, scalar_prefetch = 0 : i64, scratch_operands = 0 : i64, tpu.core_type = #tpu.core_type<tc>, window_params = [{transform_indices = @transform_0, window_bounds = array<i64: 16, 16>}, {pipeline_mode = #tpu.pipeline_mode<synchronous>, transform_indices = @transform_1, window_bounds = array<i64: 16, 128>}, {pipeline_mode = #tpu.pipeline_mode<synchronous>, transform_indices = @transform_2, window_bounds = array<i64: 1, 128>}, {pipeline_mode = #tpu.pipeline_mode<synchronous>, transform_indices = @transform_3, window_bounds = array<i64: 128, 128>}, {pipeline_mode = #tpu.pipeline_mode<synchronous>, transform_indices = @transform_4, window_bounds = array<i64: 1, 128>}, {pipeline_mode = #tpu.pipeline_mode<synchronous>, transform_indices = @transform_5, window_bounds = array<i64: 128, 4>}, {pipeline_mode = #tpu.pipeline_mode<synchronous>, transform_indices = @transform_6, window_bounds = array<i64: 1, 4>}, {transform_indices = @transform_7, window_bounds = array<i64: 16, 4>}]} {
    %c0 = arith.constant 0 : index
    %c0_0 = arith.constant 0 : index
    %0 = vector.load %arg1[%c0, %c0_0] : memref<16x16xf32, #tpu.memory_space<vmem>>, vector<16x16xf32>
    %1 = arith.truncf %0 : vector<16x16xf32> to vector<16x16xbf16>
    %c0_1 = arith.constant 0 : index
    %c0_2 = arith.constant 0 : index
    %2 = vector.load %arg2[%c0_1, %c0_2] : memref<16x128xbf16, #tpu.memory_space<vmem>>, vector<16x128xbf16>
    %cst = arith.constant dense<0.000000e+00> : vector<16x128xf32>
    %3 = tpu.matmul %1, %2, %cst {dimension_numbers = #tpu.dot_dimension_numbers<[1], [0], [0], [1], [0, 0, 1, 1], [], []>} : vector<16x16xbf16>, vector<16x128xbf16>, vector<16x128xf32> -> vector<16x128xf32>
    %c0_3 = arith.constant 0 : index
    %c0_4 = arith.constant 0 : index
    %4 = vector.load %arg3[%c0_3, %c0_4] : memref<1x128xf32, #tpu.memory_space<vmem>>, vector<1x128xf32>
    %5 = vector.broadcast %4 : vector<1x128xf32> to vector<16x128xf32>
    %6 = arith.addf %3, %5 : vector<16x128xf32>
    %7 = math.tanh %6 : vector<16x128xf32>
    %8 = arith.truncf %7 : vector<16x128xf32> to vector<16x128xbf16>
    %c0_5 = arith.constant 0 : index
    %c0_6 = arith.constant 0 : index
    %9 = vector.load %arg4[%c0_5, %c0_6] : memref<128x128xbf16, #tpu.memory_space<vmem>>, vector<128x128xbf16>
    %cst_7 = arith.constant dense<0.000000e+00> : vector<16x128xf32>
    %10 = tpu.matmul %8, %9, %cst_7 {dimension_numbers = #tpu.dot_dimension_numbers<[1], [0], [0], [1], [0, 0, 1, 1], [], []>} : vector<16x128xbf16>, vector<128x128xbf16>, vector<16x128xf32> -> vector<16x128xf32>
    %c0_8 = arith.constant 0 : index
    %c0_9 = arith.constant 0 : index
    %11 = vector.load %arg5[%c0_8, %c0_9] : memref<1x128xf32, #tpu.memory_space<vmem>>, vector<1x128xf32>
    %12 = vector.broadcast %11 : vector<1x128xf32> to vector<16x128xf32>
    %13 = arith.addf %10, %12 : vector<16x128xf32>
    %14 = math.tanh %13 : vector<16x128xf32>
    %15 = arith.truncf %14 : vector<16x128xf32> to vector<16x128xbf16>
    %c0_10 = arith.constant 0 : index
    %c0_11 = arith.constant 0 : index
    %16 = vector.load %arg6[%c0_10, %c0_11] : memref<128x4xbf16, #tpu.memory_space<vmem>>, vector<128x4xbf16>
    %cst_12 = arith.constant dense<0.000000e+00> : vector<16x4xf32>
    %17 = tpu.matmul %15, %16, %cst_12 {dimension_numbers = #tpu.dot_dimension_numbers<[1], [0], [0], [1], [0, 0, 1, 1], [], []>} : vector<16x128xbf16>, vector<128x4xbf16>, vector<16x4xf32> -> vector<16x4xf32>
    %c0_13 = arith.constant 0 : index
    %c0_14 = arith.constant 0 : index
    %18 = vector.load %arg7[%c0_13, %c0_14] : memref<1x4xf32, #tpu.memory_space<vmem>>, vector<1x4xf32>
    %19 = vector.broadcast %18 : vector<1x4xf32> to vector<16x4xf32>
    %20 = arith.addf %17, %19 : vector<16x4xf32>
    %cst_15 = arith.constant dense<0xFF800000> : vector<16xf32>
    %21 = vector.multi_reduction <maximumf>, %20, %cst_15 [1] : vector<16x4xf32> to vector<16xf32>
    %22 = vector.shape_cast %21 : vector<16xf32> to vector<16x1xf32>
    %23 = vector.broadcast %22 : vector<16x1xf32> to vector<16x4xf32>
    %24 = arith.subf %20, %23 : vector<16x4xf32>
    %25 = math.exp %24 : vector<16x4xf32>
    %cst_16 = arith.constant dense<0.000000e+00> : vector<16xf32>
    %26 = vector.multi_reduction <add>, %25, %cst_16 [1] : vector<16x4xf32> to vector<16xf32>
    %27 = vector.shape_cast %26 : vector<16xf32> to vector<16x1xf32>
    %28 = vector.broadcast %27 : vector<16x1xf32> to vector<16x4xf32>
    %29 = arith.divf %25, %28 : vector<16x4xf32>
    %c0_17 = arith.constant 0 : index
    %c0_18 = arith.constant 0 : index
    %30 = vector.load %arg8[%c0_17, %c0_18] : memref<16x4xf32, #tpu.memory_space<vmem>>, vector<16x4xf32>
    tpu.vector_store %arg8[%c0_17, %c0_18], %29 {strides = array<i32>} : memref<16x4xf32, #tpu.memory_space<vmem>>, vector<16x4xf32>,
    return
  }
  func.func @transform_0(%arg0: i32) -> (i32, i32) {
    %c0_i32 = arith.constant 0 : i32
    %c0_i32_0 = arith.constant 0 : i32
    return %arg0, %c0_i32 : i32, i32
  }
  func.func @transform_1(%arg0: i32) -> (i32, i32) {
    %c0_i32 = arith.constant 0 : i32
    %c0_i32_0 = arith.constant 0 : i32
    %c0_i32_1 = arith.constant 0 : i32
    return %c0_i32, %c0_i32_0 : i32, i32
  }
  func.func @transform_2(%arg0: i32) -> (i32, i32) {
    %c0_i32 = arith.constant 0 : i32
    %c0_i32_0 = arith.constant 0 : i32
    %c0_i32_1 = arith.constant 0 : i32
    return %c0_i32, %c0_i32_0 : i32, i32
  }
  func.func @transform_3(%arg0: i32) -> (i32, i32) {
    %c0_i32 = arith.constant 0 : i32
    %c0_i32_0 = arith.constant 0 : i32
    %c0_i32_1 = arith.constant 0 : i32
    return %c0_i32, %c0_i32_0 : i32, i32
  }
  func.func @transform_4(%arg0: i32) -> (i32, i32) {
    %c0_i32 = arith.constant 0 : i32
    %c0_i32_0 = arith.constant 0 : i32
    %c0_i32_1 = arith.constant 0 : i32
    return %c0_i32, %c0_i32_0 : i32, i32
  }
  func.func @transform_5(%arg0: i32) -> (i32, i32) {
    %c0_i32 = arith.constant 0 : i32
    %c0_i32_0 = arith.constant 0 : i32
    %c0_i32_1 = arith.constant 0 : i32
    return %c0_i32, %c0_i32_0 : i32, i32
  }
  func.func @transform_6(%arg0: i32) -> (i32, i32) {
    %c0_i32 = arith.constant 0 : i32
    %c0_i32_0 = arith.constant 0 : i32
    %c0_i32_1 = arith.constant 0 : i32
    return %c0_i32, %c0_i32_0 : i32, i32
  }
  func.func @transform_7(%arg0: i32) -> (i32, i32) {
    %c0_i32 = arith.constant 0 : i32
    %c0_i32_0 = arith.constant 0 : i32
    return %arg0, %c0_i32 : i32, i32
  }
}

</mosaic_0001>

<bundles_post_ra>
// kernel: tpu_custom_call.1
= control target key start
LH: loop header
LB: loop body
LE: loop exit
PB: predicated region body
PF: predicated region fallthrough
CT: control target
= control target key end

     0   :  { %12 = vsyncpa [#allocation3], 0  ;;  %s603_s0 = inlined_call_operand.hbm [shape: f32[16,16], index: 0, kind: input, shape index: {}]   ;;  %s604_s1 = inlined_call_operand.hbm [shape: bf16[16,128], index: 1, kind: input, shape index: {}]   ;;  %s605_s2 = inlined_call_operand.vmem [shape: f32[1,128], index: 2, kind: input, shape index: {}]   ;;  %s606_s3 = inlined_call_operand.vmem [shape: bf16[128,128], index: 3, kind: input, shape index: {}]   ;;  %s607_s4 = inlined_call_operand.vmem [shape: f32[1,128], index: 4, kind: input, shape index: {}]   ;;  %s608_s5 = inlined_call_operand.vmem [shape: bf16[128,4], index: 5, kind: input, shape index: {}]   ;;  %s609_s6 = inlined_call_operand.vmem [shape: f32[1,4], index: 6, kind: input, shape index: {}]   ;;  %s610_s7 = inlined_call_operand.vmem [shape: f32[16,4], index: 7, kind: output, shape index: {}]  }
   0x1   :  { %s18_s26 = sshll.u32 %s603_s0, 4  ;;  %s19_s26 = int_to_ptr.hbm [resolvable:$true] %s18_s26 }
   0x2   :  { %13 = vsyncpa [#allocation5], 0  ;;  %s482_s27 = smov [#allocation2]   ;;  %s31_s8 = sshll.u32 %s604_s1, 4  ;;  %s32_s8 = int_to_ptr.hbm [resolvable:$true] %s31_s8 }
   0x3   :  { %s20_s28 = sshll.u32 %s482_s27, 4  ;;  %s483_s9 = smov 128   ;;  %s21_s28 = int_to_ptr.vmem [resolvable:$true] %s20_s28 }
   0x4   :  { %s484_s10 = smov 8   ;;  %s485_s11 = smov [#allocation4]  }
   0x5   :  { %26 = dma.hbm_to_vmem [thread:$0]  %s19_s26, 256, %s21_s28, [#allocation3], %s483_s9, %s483_s9, %s484_s10  }
   0x6   :  { %s33_s12 = sshll.u32 %s485_s11, 4  ;;  %s486_s13 = smov 64   ;;  %s34_s12 = int_to_ptr.vmem [resolvable:$true] %s33_s12 }
   0x7   :  { %s487_s14 = smov 4  }
   0x8   :  { %39 = dma.hbm_to_vmem [thread:$0]  %s32_s8, 128, %s34_s12, [#allocation5], %s486_s13, %s486_s13, %s487_s14  }
   0x9   :  { %478 = dma.done.wait [#allocation3], 256  }
   0xa   :  { %479 = vsyncadd [#allocation3], 4294967040 }
   0xb   :  { %480 = dma.done.wait [#allocation5], 128  }
   0xc   :  { %481 = vsyncadd [#allocation5], 4294967168  ;;  %v388_v0 = vld [vmem:[#allocation4] sm:$0xff]  ;;  %v59_v1 = vld [vmem:[#allocation2] sm:$0xff]  ;;  %vm74_vm0 = vcmask 130048   ;;  %vm262_vm1 = vcmask 31744  }
   0xd   :  { %v60_v2 = vld [vmem:[#allocation2 + $0x8] sm:$0xff]  ;;  %v396_v4 = vld [vmem:[%s606_s3 + $0x38] sm:$0xff]  ;;  %85 = vmatpush.bf16.msra.mxu0 %v388_v0  ;;  %v395_v5 = vld [vmem:[%s606_s3 + $0x30] sm:$0xff] }
   0xe   :  { %v61_v3 = vpack.c.bf16 %v60_v2, %v59_v1  ;;  %163 = vmatpush.bf16.msra.mxu1 %v396_v4  ;;  %v394_v6 = vld [vmem:[%s606_s3 + $0x28] sm:$0xff]  ;;  %v393_v7 = vld [vmem:[%s606_s3 + $0x20] sm:$0xff]  ;;  %v392_v8 = vld [vmem:[%s606_s3 + $0x18] sm:$0xff] }
   0xf   :  { %v391_v9 = vld [vmem:[%s606_s3 + $0x10] sm:$0xff]  ;;  %v390_v10 = vld [vmem:[%s606_s3 + $0x8] sm:$0xff]  ;;  %v389_v11 = vld [vmem:[%s606_s3] sm:$0xff] }
  0x10   :  { %323 = vmatmul.msk.bf16.vlgmr.msra.gmra.mxu0 %vm74_vm0, %v61_v3  ;;  %v404_v12 = vld [vmem:[%s608_s5 + $0x38] sm:$0xff]  ;;  %v403_v13 = vld [vmem:[%s608_s5 + $0x30] sm:$0xff]  ;;  %v402_v14 = vld [vmem:[%s608_s5 + $0x28] sm:$0xff] }
  0x11   :  { %248 = vmatpush.bf16.msra.mxu2 %v404_v12  ;;  %v411_v16 = vld [vmem:[%s605_s2] ss:$0 sm:$0xff]  ;;  %v400_v24 = vld [vmem:[%s608_s5 + $0x18] sm:$0xff]  ;;  %v399_v25 = vld [vmem:[%s608_s5 + $0x10] sm:$0xff] }
  0x12   :  { %164 = vmatpush.bf16.msra.mxu1 %v395_v5  ;;  %v401_v23 = vld [vmem:[%s608_s5 + $0x20] sm:$0xff]  ;;  %v398_v26 = vld [vmem:[%s608_s5 + $0x8] sm:$0xff] }
  0x13   :  { %v397_v27 = vld [vmem:[%s608_s5] sm:$0xff] }
  0x14   :  { %v412_v29 = vld [vmem:[%s607_s4] ss:$0 sm:$0xff] }
  0x15   :  { %249 = vmatpush.bf16.msra.mxu2 %v403_v13  ;;  %v413_v36 = vld [vmem:[%s609_s6] ss:$0 sm:$0xff] }
  0x16   :  { %165 = vmatpush.bf16.msra.mxu1 %v394_v6 }
  0x19   :  { %250 = vmatpush.bf16.msra.mxu2 %v402_v14 }
  0x1a   :  { %166 = vmatpush.bf16.msra.mxu1 %v393_v7 }
  0x1d   :  { %251 = vmatpush.bf16.msra.mxu2 %v401_v23 }
  0x1e   :  { %167 = vmatpush.bf16.msra.mxu1 %v392_v8 }
  0x21   :  { %252 = vmatpush.bf16.msra.mxu2 %v400_v24 }
  0x22   :  { %168 = vmatpush.bf16.msra.mxu1 %v391_v9 }
  0x25   :  { %253 = vmatpush.bf16.msra.mxu2 %v399_v25 }
  0x26   :  { %169 = vmatpush.bf16.msra.mxu1 %v390_v10 }
  0x29   :  { %254 = vmatpush.bf16.msra.mxu2 %v398_v26 }
  0x2a   :  { %170 = vmatpush.bf16.msra.mxu1 %v389_v11 }
  0x2d   :  { %255 = vmatpush.bf16.msra.mxu2 %v397_v27 }
  0x8d   :  { %v87_v15 = vpop.f32.mrf.mxu0 }
  0x8e   :  { %v88_v17 = vadd.f32 %v411_v16, %v87_v15 }
  0x90   :  { %414 = vtanh.f32 %v88_v17 }
  0x95   :  { %v89_v18 = vpop.f32.mrf.mxu0 }
  0x96   :  { %v90_v19 = vadd.f32 %v411_v16, %v89_v18  ;;  %v415_v20 = vpop.eup %414 }
  0x98   :  { %416 = vtanh.f32 %v90_v19 }
  0x9e   :  { %v417_v21 = vpop.eup %416 }
  0x9f   :  { %v94_v22 = vpack.c.bf16 %v417_v21, %v415_v20 }
  0xa1   :  { %171 = vmatmul.bf16.vlgmr.msra.gmra.mxu1 %v94_v22 }
 0x11e   :  { %v172_v28 = vpop.f32.mrf.mxu1 }
 0x11f   :  { %v173_v30 = vadd.f32 %v412_v29, %v172_v28 }
 0x121   :  { %418 = vtanh.f32 %v173_v30 }
 0x126   :  { %v174_v31 = vpop.f32.mrf.mxu1 }
 0x127   :  { %v175_v32 = vadd.f32 %v412_v29, %v174_v31  ;;  %v419_v33 = vpop.eup %418 }
 0x129   :  { %420 = vtanh.f32 %v175_v32 }
 0x12f   :  { %v421_v34 = vpop.eup %420 }
 0x130   :  { %v179_v35 = vpack.c.bf16 %v421_v34, %v419_v33 }
 0x132   :  { %256 = vmatmul.bf16.vlgmr.msra.gmra.mxu2 %v179_v35 }
 0x1b5   :  { %v257_v37 = vpop.f32.mrf.mxu2 }
 0x1b6   :  { %v258_v38 = vadd.f32 %v413_v36, %v257_v37 }
 0x1b8   :  { %v263_v39 = vsel %vm262_vm1, %v258_v38, -inf }
 0x1b9   :  { %264 = vmax.xlane.f32.xlu0 %v263_v39 }
 0x1bd   :  { %v259_v40 = vpop.f32.mrf.mxu2 }
 0x1be   :  { %v260_v41 = vadd.f32 %v413_v36, %v259_v40 }
 0x1c0   :  { %v266_v42 = vsel %vm262_vm1, %v260_v41, -inf }
 0x1c1   :  { %267 = vmax.xlane.f32.xlu0 %v266_v42 }
 0x22c   :  { %v265_v43 = vpop.xlane.xlu0 %264 }
 0x22d   :  { %v269_v44 = vsub.f32 %v258_v38, %v265_v43 }
 0x22f   :  { %v271_v45 = vmul.f32 1.442695, %v269_v44 }
 0x231   :  { %422 = vpow2.f32 %v271_v45 }
 0x234   :  { %v268_v46 = vpop.xlane.xlu0 %267 }
 0x235   :  { %v270_v47 = vsub.f32 %v260_v41, %v268_v46 }
 0x237   :  { %v423_v48 = vpop.eup %422  ;;  %v273_v49 = vmul.f32 1.442695, %v270_v47 }
 0x238   :  { %v275_v50 = vsel %vm262_vm1, %v423_v48, 0.0 }
 0x239   :  { %424 = vpow2.f32 %v273_v49  ;;  %276 = vadd.xlane.f32.xlu1 %v275_v50 }
 0x23f   :  { %v425_v51 = vpop.eup %424 }
 0x240   :  { %v278_v52 = vsel %vm262_vm1, %v425_v51, 0.0 }
 0x241   :  { %279 = vadd.xlane.f32.xlu1 %v278_v52 }
 0x2ac   :  { %v277_v53 = vpop.xlane.xlu1 %276 }
 0x2ad   :  { %426 = vrcp.f32 %v277_v53  ;;  %v292_v58 = vand.u32 2147483648, %v277_v53  ;;  %v290_v60 = vand.u32 2147483647, %v277_v53  ;;  %vm286_vm3 = vweird.f32 %v277_v53 }
 0x2af   :  { %v293_v63 = vor.u32 1.1754944e-38, %v292_v58  ;;  %vm291_vm5 = vcmp.eq.f32.partialorder %v290_v60, 8.507059e+37 }
 0x2b3   :  { %v427_v54 = vpop.eup %426 }
 0x2b4   :  { %v282_v55 = vmul.f32 %v427_v54, %v277_v53  ;;  %v280_v56 = vpop.xlane.xlu1 %279  ;;  %vm287_vm2 = vweird.f32 %v427_v54 }
 0x2b5   :  { %428 = vrcp.f32 %v280_v56  ;;  %vm288_vm4 = vmor %vm286_vm3, %vm287_vm2  ;;  %v307_v5 = vand.u32 2147483648, %v280_v56  ;;  %v305_v7 = vand.u32 2147483647, %v280_v56  ;;  %vm301_vm7 = vweird.f32 %v280_v56 }
 0x2b6   :  { %v283_v57 = vsub.f32 1.0, %v282_v55 }
 0x2b7   :  { %v308_v9 = vor.u32 1.1754944e-38, %v307_v5  ;;  %vm306_vm9 = vcmp.eq.f32.partialorder %v305_v7, 8.507059e+37 }
 0x2b8   :  { %v284_v59 = vmul.f32 %v427_v54, %v283_v57 }
 0x2ba   :  { %v285_v61 = vadd.f32 %v427_v54, %v284_v59 }
 0x2bb   :  { %v429_v62 = vpop.eup %428 }
 0x2bc   :  { %v289_v0 = vsel %vm288_vm4, %v427_v54, %v285_v61  ;;  %v297_v1 = vmul.f32 %v429_v62, %v280_v56  ;;  %vm302_vm6 = vweird.f32 %v429_v62 }
 0x2bd   :  { %v294_v2 = vsel %vm291_vm5, %v293_v63, %v289_v0  ;;  %vm303_vm8 = vmor %vm301_vm7, %vm302_vm6 }
 0x2be   :  { %v295_v3 = vmul.f32 %v423_v48, %v294_v2  ;;  %v298_v4 = vsub.f32 1.0, %v297_v1 }
 0x2c0   :  { %311 = vst.msk [vmem:[%s610_s7] sm:$0xff] %vm262_vm1, %v295_v3  ;;  %v299_v6 = vmul.f32 %v429_v62, %v298_v4 }
 0x2c2   :  { %v300_v8 = vadd.f32 %v429_v62, %v299_v6 }
 0x2c4   :  { %v304_v10 = vsel %vm303_vm8, %v429_v62, %v300_v8 }
 0x2c5   :  { %v309_v11 = vsel %vm306_vm9, %v308_v9, %v304_v10 }
 0x2c6   :  { %v310_v12 = vmul.f32 %v425_v51, %v309_v11 }
 0x2c8   :  { %312 = vst.msk [vmem:[%s610_s7 + $0x8] sm:$0xff] %vm262_vm1, %v310_v12 }
 0x2c9   :  { %317 = vsyncpa [#allocation3], 1 }
 0x2ca   :  { %318 = vsyncpa [#allocation5], 1 }

</bundles_post_ra>
